<compile_context>
chip_gen: v7x
topology: tpu7x:2x2x1
jax: 0.10.0
libtpu: 0.0.40
codegen_flags: <defaults>
</compile_context>

<pallas_src>
import jax
import jax.numpy as jnp
from jax import lax
from jax.experimental import pallas as pl
from jax.experimental.pallas import tpu as pltpu

K = 5
SLAB = 8  # padded lane width of the (attn | argmax) output slab

# dot_general dimension numbers.
_TRANS_B = (((1,), (1,)), ((), ()))   # A @ B.T without materializing a transpose
_NO_TRANS = (((1,), (0,)), ((), ()))  # A @ B


def mask_generator_kernel(sp_z_ref, sp_w_ref, ctx_ref, wmap_ref,
                          aligned_ref, out_ref, slab_ref):
    B, V = sp_z_ref.shape

    ctx = ctx_ref[...].astype(jnp.float32)
    wmap = wmap_ref[...].astype(jnp.float32)
    sp_w = sp_w_ref[...].astype(jnp.float32)

    # (1) aligned_ctx = ctx_emb @ W_map^T   (PyTorch Linear, no bias).  MXU #1.
    aligned = lax.dot_general(ctx, wmap, _TRANS_B,
                              preferred_element_type=jnp.float32)
    aligned_ref[...] = aligned.astype(aligned_ref.dtype)

    # (2) All-slot scores S_all[b, v] = <aligned[b], sp_w[v]>.  MXU #2.
    #     Hoisted out of the top-K loop: replaces K serial gather-matmuls
    #     plus K E-wide reductions on the critical path.
    s_all = lax.dot_general(aligned, sp_w, _TRANS_B,
                            preferred_element_type=jnp.float32)       # (B, V)

    sp_z = sp_z_ref[...].astype(jnp.float32)
    col = lax.broadcasted_iota(jnp.int32, (B, V), 1)

    # Iterative top-K (K tiny & static).  Per step: max-reduce, first-occurrence
    # min-reduce (tie-break = lowest index, matching jax.lax.top_k), mask update,
    # and a masked lane-reduce of the precomputed all-slot scores.
    z = sp_z
    sel_list = []
    score_cols = []                                                   # K x (B, 1)
    for _ in range(K):
        mx = jnp.max(z, axis=1, keepdims=True)                        # (B, 1)
        idx_k = jnp.min(jnp.where(z == mx, col, V), axis=1, keepdims=True)
        sel = col == idx_k                                            # (B, V) one-hot
        z = jnp.where(sel, -jnp.inf, z)
        sel_list.append(sel)
        score_cols.append(jnp.sum(jnp.where(sel, s_all, 0.0),
                                  axis=1, keepdims=True))             # (B, 1)

    # Softmax over the K (B,1) score columns — pure VPU, no lane concat and no
    # extra cross-lane reductions.
    m = score_cols[0]
    for k in range(1, K):
        m = jnp.maximum(m, score_cols[k])
    e_cols = [jnp.exp(c - m) for c in score_cols]
    denom = e_cols[0]
    for k in range(1, K):
        denom = denom + e_cols[k]
    inv = 1.0 / denom                                                 # exact (matches ref)
    attn_cols = [e * inv for e in e_cols]                             # K x (B, 1)

    # (3) out = sum_k attn_k * sp_w[idx_k]  ==  W1h @ sp_w  with
    #     W1h[b, v] = attn_k[b] if v == idx_k[b] else 0.   MXU #3.
    w1h = jnp.zeros((B, V), jnp.float32)
    for k in range(K):
        w1h = w1h + jnp.where(sel_list[k], attn_cols[k], 0.0)
    out = lax.dot_general(w1h, sp_w, _NO_TRANS,
                          preferred_element_type=jnp.float32)
    out_ref[...] = out.astype(out_ref.dtype)

    # argmax over the K attention weights (== argmax of scores, softmax is
    # monotone), first-occurrence tie-break, via a VPU compare chain.
    best_val = score_cols[0]
    best_idx = jnp.zeros((B, 1), jnp.float32)
    for k in range(1, K):
        better = score_cols[k] > best_val
        best_val = jnp.where(better, score_cols[k], best_val)
        best_idx = jnp.where(better, jnp.float32(k), best_idx)

    # Pack attn columns + argmax into one padded (B, SLAB) f32 slab (single store).
    colS = lax.broadcasted_iota(jnp.int32, (B, SLAB), 1)
    slab = jnp.zeros((B, SLAB), jnp.float32)
    for k in range(K):
        slab = jnp.where(colS == k, attn_cols[k], slab)
    slab = jnp.where(colS == K, best_idx, slab)
    slab_ref[...] = slab.astype(slab_ref.dtype)


def _full_spec(shape):
    nd = len(shape)
    return pl.BlockSpec(shape, lambda i, _nd=nd: (0,) * _nd)


@jax.jit
def mask_generator_soft(sp_z, sp_w, ctx_emb, w_map):
    B, V = sp_z.shape
    E = sp_w.shape[1]
    out_shapes = (
        jax.ShapeDtypeStruct((B, E), jnp.float32),     # aligned_ctx
        jax.ShapeDtypeStruct((B, E), jnp.float32),     # out
        jax.ShapeDtypeStruct((B, SLAB), jnp.float32),  # [attn(K) | argmax | pad]
    )
    aligned, out, slab = pl.pallas_call(
        mask_generator_kernel,
        out_shape=out_shapes,
        grid=(1,),
        in_specs=[_full_spec(sp_z.shape), _full_spec(sp_w.shape),
                  _full_spec(ctx_emb.shape), _full_spec(w_map.shape)],
        out_specs=(_full_spec((B, E)), _full_spec((B, E)),
                   _full_spec((B, SLAB))),
        compiler_params=pltpu.CompilerParams(
            dimension_semantics=("arbitrary",)),
    )(sp_z, sp_w, ctx_emb, w_map)
    attn = slab[:, :K]
    amax = slab[:, K].astype(jnp.int32)
    return aligned, out, attn.reshape(B, K, 1), amax


def ref_forward(sp_z, sp_w, ctx_emb, w_map):
    """Pure-JAX reference mirroring the PyTorch forward (mode='soft')."""
    aligned = ctx_emb @ w_map.T
    _, indices = jax.lax.top_k(sp_z, K)
    topW = sp_w[indices]                                  # (B, K, E)
    scores = jnp.einsum('bke,be->bk', topW, aligned)
    attn = jax.nn.softmax(scores, axis=1)
    out = jnp.sum(topW * attn[..., None], axis=1)
    amax = jnp.argmax(attn, axis=1)
    return aligned, out, attn[..., None], amax


if __name__ == "__main__":
    key = jax.random.PRNGKey(0)
    B, V, E = 8, 32, 32  # batch, num slots, enc_dim
    k1, k2, k3 = jax.random.split(key, 3)
    sp_z = jax.random.normal(k1, (B, V), dtype=jnp.float32)
    sp_w = jax.random.normal(k2, (V, E), dtype=jnp.float32)
    ctx_emb = jax.random.normal(k3, (B, E), dtype=jnp.float32)
    # mapping.weight initialized to the identity, exactly as in __init__.
    w_map = jnp.eye(E, dtype=jnp.float32)

    outs = mask_generator_soft(sp_z, sp_w, ctx_emb, w_map)
    jax.block_until_ready(outs)

    ref = ref_forward(sp_z, sp_w, ctx_emb, w_map)
    assert jnp.allclose(outs[0], ref[0], atol=1e-5, rtol=1e-5)
    assert jnp.allclose(outs[1], ref[1], atol=1e-5, rtol=1e-5)
    assert jnp.allclose(outs[2], ref[2], atol=1e-5, rtol=1e-5)
    assert jnp.array_equal(outs[3].astype(jnp.int32), ref[3].astype(jnp.int32))

    print("KERNEL_OK")
</pallas_src>

<mosaic_0001>
module attributes {stable_mosaic.version = 11 : i64} {
  func.func @mask_generator_kernel(%arg0: i32, %arg1: memref<8x32xf32, #tpu.memory_space<vmem>>, %arg2: memref<32x32xf32, #tpu.memory_space<vmem>>, %arg3: memref<8x32xf32, #tpu.memory_space<vmem>>, %arg4: memref<32x32xf32, #tpu.memory_space<vmem>>, %arg5: memref<8x32xf32, #tpu.memory_space<vmem>>, %arg6: memref<8x32xf32, #tpu.memory_space<vmem>>, %arg7: memref<8x8xf32, #tpu.memory_space<vmem>>) attributes {dimension_semantics = [#tpu.dimension_semantics<arbitrary>], iteration_bounds = array<i64: 1>, scalar_prefetch = 0 : i64, scratch_operands = 0 : i64, tpu.core_type = #tpu.core_type<tc>, window_params = [{pipeline_mode = #tpu.pipeline_mode<synchronous>, transform_indices = @transform_0, window_bounds = array<i64: 8, 32>}, {pipeline_mode = #tpu.pipeline_mode<synchronous>, transform_indices = @transform_1, window_bounds = array<i64: 32, 32>}, {pipeline_mode = #tpu.pipeline_mode<synchronous>, transform_indices = @transform_2, window_bounds = array<i64: 8, 32>}, {pipeline_mode = #tpu.pipeline_mode<synchronous>, transform_indices = @transform_3, window_bounds = array<i64: 32, 32>}, {pipeline_mode = #tpu.pipeline_mode<synchronous>, transform_indices = @transform_4, window_bounds = array<i64: 8, 32>}, {pipeline_mode = #tpu.pipeline_mode<synchronous>, transform_indices = @transform_5, window_bounds = array<i64: 8, 32>}, {pipeline_mode = #tpu.pipeline_mode<synchronous>, transform_indices = @transform_6, window_bounds = array<i64: 8, 8>}]} {
    %c0 = arith.constant 0 : index
    %c0_0 = arith.constant 0 : index
    %0 = vector.load %arg3[%c0, %c0_0] : memref<8x32xf32, #tpu.memory_space<vmem>>, vector<8x32xf32>
    %c0_1 = arith.constant 0 : index
    %c0_2 = arith.constant 0 : index
    %1 = vector.load %arg4[%c0_1, %c0_2] : memref<32x32xf32, #tpu.memory_space<vmem>>, vector<32x32xf32>
    %c0_3 = arith.constant 0 : index
    %c0_4 = arith.constant 0 : index
    %2 = vector.load %arg2[%c0_3, %c0_4] : memref<32x32xf32, #tpu.memory_space<vmem>>, vector<32x32xf32>
    %cst = arith.constant dense<0.000000e+00> : vector<8x32xf32>
    %3 = tpu.matmul %0, %1, %cst {dimension_numbers = #tpu.dot_dimension_numbers<[1], [1], [0], [0], [0, 0, 1, 0], [], []>} : vector<8x32xf32>, vector<32x32xf32>, vector<8x32xf32> -> vector<8x32xf32>
    %c0_5 = arith.constant 0 : index
    %c0_6 = arith.constant 0 : index
    %4 = vector.load %arg5[%c0_5, %c0_6] : memref<8x32xf32, #tpu.memory_space<vmem>>, vector<8x32xf32>
    tpu.vector_store %arg5[%c0_5, %c0_6], %3 {strides = array<i32>} : memref<8x32xf32, #tpu.memory_space<vmem>>, vector<8x32xf32>,
    %cst_7 = arith.constant dense<0.000000e+00> : vector<8x32xf32>
    %5 = tpu.matmul %3, %2, %cst_7 {dimension_numbers = #tpu.dot_dimension_numbers<[1], [1], [0], [0], [0, 0, 1, 0], [], []>} : vector<8x32xf32>, vector<32x32xf32>, vector<8x32xf32> -> vector<8x32xf32>
    %c0_8 = arith.constant 0 : index
    %c0_9 = arith.constant 0 : index
    %6 = vector.load %arg1[%c0_8, %c0_9] : memref<8x32xf32, #tpu.memory_space<vmem>>, vector<8x32xf32>
    %7 = tpu.iota {dimensions = array<i32: 1>} : vector<8x32xi32>
    %cst_10 = arith.constant dense<0xFF800000> : vector<8xf32>
    %8 = vector.multi_reduction <maximumf>, %6, %cst_10 [1] : vector<8x32xf32> to vector<8xf32>
    %9 = vector.shape_cast %8 : vector<8xf32> to vector<8x1xf32>
    %10 = vector.broadcast %9 : vector<8x1xf32> to vector<8x32xf32>
    %11 = arith.cmpf oeq, %6, %10 : vector<8x32xf32>
    %c32_i32 = arith.constant 32 : i32
    %12 = vector.broadcast %c32_i32 : i32 to vector<8x32xi32>
    %13 = arith.select %11, %7, %12 : vector<8x32xi1>, vector<8x32xi32>
    %cst_11 = arith.constant dense<2147483647> : vector<8xi32>
    %14 = vector.multi_reduction <minsi>, %13, %cst_11 [1] : vector<8x32xi32> to vector<8xi32>
    %15 = vector.shape_cast %14 : vector<8xi32> to vector<8x1xi32>
    %16 = vector.broadcast %15 : vector<8x1xi32> to vector<8x32xi32>
    %17 = arith.cmpi eq, %7, %16 : vector<8x32xi32>
    %cst_12 = arith.constant 0xFF800000 : f32
    %18 = vector.broadcast %cst_12 : f32 to vector<8x32xf32>
    %19 = arith.select %17, %18, %6 : vector<8x32xi1>, vector<8x32xf32>
    %cst_13 = arith.constant 0.000000e+00 : f32
    %20 = vector.broadcast %cst_13 : f32 to vector<8x32xf32>
    %21 = arith.select %17, %5, %20 : vector<8x32xi1>, vector<8x32xf32>
    %cst_14 = arith.constant dense<0.000000e+00> : vector<8xf32>
    %22 = vector.multi_reduction <add>, %21, %cst_14 [1] : vector<8x32xf32> to vector<8xf32>
    %23 = vector.shape_cast %22 : vector<8xf32> to vector<8x1xf32>
    %cst_15 = arith.constant dense<0xFF800000> : vector<8xf32>
    %24 = vector.multi_reduction <maximumf>, %19, %cst_15 [1] : vector<8x32xf32> to vector<8xf32>
    %25 = vector.shape_cast %24 : vector<8xf32> to vector<8x1xf32>
    %26 = vector.broadcast %25 : vector<8x1xf32> to vector<8x32xf32>
    %27 = arith.cmpf oeq, %19, %26 : vector<8x32xf32>
    %c32_i32_16 = arith.constant 32 : i32
    %28 = vector.broadcast %c32_i32_16 : i32 to vector<8x32xi32>
    %29 = arith.select %27, %7, %28 : vector<8x32xi1>, vector<8x32xi32>
    %cst_17 = arith.constant dense<2147483647> : vector<8xi32>
    %30 = vector.multi_reduction <minsi>, %29, %cst_17 [1] : vector<8x32xi32> to vector<8xi32>
    %31 = vector.shape_cast %30 : vector<8xi32> to vector<8x1xi32>
    %32 = vector.broadcast %31 : vector<8x1xi32> to vector<8x32xi32>
    %33 = arith.cmpi eq, %7, %32 : vector<8x32xi32>
    %cst_18 = arith.constant 0xFF800000 : f32
    %34 = vector.broadcast %cst_18 : f32 to vector<8x32xf32>
    %35 = arith.select %33, %34, %19 : vector<8x32xi1>, vector<8x32xf32>
    %cst_19 = arith.constant 0.000000e+00 : f32
    %36 = vector.broadcast %cst_19 : f32 to vector<8x32xf32>
    %37 = arith.select %33, %5, %36 : vector<8x32xi1>, vector<8x32xf32>
    %cst_20 = arith.constant dense<0.000000e+00> : vector<8xf32>
    %38 = vector.multi_reduction <add>, %37, %cst_20 [1] : vector<8x32xf32> to vector<8xf32>
    %39 = vector.shape_cast %38 : vector<8xf32> to vector<8x1xf32>
    %cst_21 = arith.constant dense<0xFF800000> : vector<8xf32>
    %40 = vector.multi_reduction <maximumf>, %35, %cst_21 [1] : vector<8x32xf32> to vector<8xf32>
    %41 = vector.shape_cast %40 : vector<8xf32> to vector<8x1xf32>
    %42 = vector.broadcast %41 : vector<8x1xf32> to vector<8x32xf32>
    %43 = arith.cmpf oeq, %35, %42 : vector<8x32xf32>
    %c32_i32_22 = arith.constant 32 : i32
    %44 = vector.broadcast %c32_i32_22 : i32 to vector<8x32xi32>
    %45 = arith.select %43, %7, %44 : vector<8x32xi1>, vector<8x32xi32>
    %cst_23 = arith.constant dense<2147483647> : vector<8xi32>
    %46 = vector.multi_reduction <minsi>, %45, %cst_23 [1] : vector<8x32xi32> to vector<8xi32>
    %47 = vector.shape_cast %46 : vector<8xi32> to vector<8x1xi32>
    %48 = vector.broadcast %47 : vector<8x1xi32> to vector<8x32xi32>
    %49 = arith.cmpi eq, %7, %48 : vector<8x32xi32>
    %cst_24 = arith.constant 0xFF800000 : f32
    %50 = vector.broadcast %cst_24 : f32 to vector<8x32xf32>
    %51 = arith.select %49, %50, %35 : vector<8x32xi1>, vector<8x32xf32>
    %cst_25 = arith.constant 0.000000e+00 : f32
    %52 = vector.broadcast %cst_25 : f32 to vector<8x32xf32>
    %53 = arith.select %49, %5, %52 : vector<8x32xi1>, vector<8x32xf32>
    %cst_26 = arith.constant dense<0.000000e+00> : vector<8xf32>
    %54 = vector.multi_reduction <add>, %53, %cst_26 [1] : vector<8x32xf32> to vector<8xf32>
    %55 = vector.shape_cast %54 : vector<8xf32> to vector<8x1xf32>
    %cst_27 = arith.constant dense<0xFF800000> : vector<8xf32>
    %56 = vector.multi_reduction <maximumf>, %51, %cst_27 [1] : vector<8x32xf32> to vector<8xf32>
    %57 = vector.shape_cast %56 : vector<8xf32> to vector<8x1xf32>
    %58 = vector.broadcast %57 : vector<8x1xf32> to vector<8x32xf32>
    %59 = arith.cmpf oeq, %51, %58 : vector<8x32xf32>
    %c32_i32_28 = arith.constant 32 : i32
    %60 = vector.broadcast %c32_i32_28 : i32 to vector<8x32xi32>
    %61 = arith.select %59, %7, %60 : vector<8x32xi1>, vector<8x32xi32>
    %cst_29 = arith.constant dense<2147483647> : vector<8xi32>
    %62 = vector.multi_reduction <minsi>, %61, %cst_29 [1] : vector<8x32xi32> to vector<8xi32>
    %63 = vector.shape_cast %62 : vector<8xi32> to vector<8x1xi32>
    %64 = vector.broadcast %63 : vector<8x1xi32> to vector<8x32xi32>
    %65 = arith.cmpi eq, %7, %64 : vector<8x32xi32>
    %cst_30 = arith.constant 0xFF800000 : f32
    %66 = vector.broadcast %cst_30 : f32 to vector<8x32xf32>
    %67 = arith.select %65, %66, %51 : vector<8x32xi1>, vector<8x32xf32>
    %cst_31 = arith.constant 0.000000e+00 : f32
    %68 = vector.broadcast %cst_31 : f32 to vector<8x32xf32>
    %69 = arith.select %65, %5, %68 : vector<8x32xi1>, vector<8x32xf32>
    %cst_32 = arith.constant dense<0.000000e+00> : vector<8xf32>
    %70 = vector.multi_reduction <add>, %69, %cst_32 [1] : vector<8x32xf32> to vector<8xf32>
    %71 = vector.shape_cast %70 : vector<8xf32> to vector<8x1xf32>
    %cst_33 = arith.constant dense<0xFF800000> : vector<8xf32>
    %72 = vector.multi_reduction <maximumf>, %67, %cst_33 [1] : vector<8x32xf32> to vector<8xf32>
    %73 = vector.shape_cast %72 : vector<8xf32> to vector<8x1xf32>
    %74 = vector.broadcast %73 : vector<8x1xf32> to vector<8x32xf32>
    %75 = arith.cmpf oeq, %67, %74 : vector<8x32xf32>
    %c32_i32_34 = arith.constant 32 : i32
    %76 = vector.broadcast %c32_i32_34 : i32 to vector<8x32xi32>
    %77 = arith.select %75, %7, %76 : vector<8x32xi1>, vector<8x32xi32>
    %cst_35 = arith.constant dense<2147483647> : vector<8xi32>
    %78 = vector.multi_reduction <minsi>, %77, %cst_35 [1] : vector<8x32xi32> to vector<8xi32>
    %79 = vector.shape_cast %78 : vector<8xi32> to vector<8x1xi32>
    %80 = vector.broadcast %79 : vector<8x1xi32> to vector<8x32xi32>
    %81 = arith.cmpi eq, %7, %80 : vector<8x32xi32>
    %cst_36 = arith.constant 0.000000e+00 : f32
    %82 = vector.broadcast %cst_36 : f32 to vector<8x32xf32>
    %83 = arith.select %81, %5, %82 : vector<8x32xi1>, vector<8x32xf32>
    %cst_37 = arith.constant dense<0.000000e+00> : vector<8xf32>
    %84 = vector.multi_reduction <add>, %83, %cst_37 [1] : vector<8x32xf32> to vector<8xf32>
    %85 = vector.shape_cast %84 : vector<8xf32> to vector<8x1xf32>
    %86 = arith.maximumf %23, %39 : vector<8x1xf32>
    %87 = arith.maximumf %86, %55 : vector<8x1xf32>
    %88 = arith.maximumf %87, %71 : vector<8x1xf32>
    %89 = arith.maximumf %88, %85 : vector<8x1xf32>
    %90 = arith.subf %23, %89 : vector<8x1xf32>
    %91 = math.exp %90 : vector<8x1xf32>
    %92 = arith.subf %39, %89 : vector<8x1xf32>
    %93 = math.exp %92 : vector<8x1xf32>
    %94 = arith.subf %55, %89 : vector<8x1xf32>
    %95 = math.exp %94 : vector<8x1xf32>
    %96 = arith.subf %71, %89 : vector<8x1xf32>
    %97 = math.exp %96 : vector<8x1xf32>
    %98 = arith.subf %85, %89 : vector<8x1xf32>
    %99 = math.exp %98 : vector<8x1xf32>
    %100 = arith.addf %91, %93 : vector<8x1xf32>
    %101 = arith.addf %100, %95 : vector<8x1xf32>
    %102 = arith.addf %101, %97 : vector<8x1xf32>
    %103 = arith.addf %102, %99 : vector<8x1xf32>
    %cst_38 = arith.constant 1.000000e+00 : f32
    %104 = vector.broadcast %cst_38 : f32 to vector<8x1xf32>
    %105 = arith.divf %104, %103 : vector<8x1xf32>
    %106 = arith.mulf %91, %105 : vector<8x1xf32>
    %107 = arith.mulf %93, %105 : vector<8x1xf32>
    %108 = arith.mulf %95, %105 : vector<8x1xf32>
    %109 = arith.mulf %97, %105 : vector<8x1xf32>
    %110 = arith.mulf %99, %105 : vector<8x1xf32>
    %cst_39 = arith.constant 0.000000e+00 : f32
    %111 = vector.broadcast %cst_39 : f32 to vector<8x32xf32>
    %cst_40 = arith.constant 0.000000e+00 : f32
    %112 = vector.shape_cast %106 : vector<8x1xf32> to vector<8x1xf32>
    %113 = vector.broadcast %112 : vector<8x1xf32> to vector<8x32xf32>
    %114 = vector.broadcast %cst_40 : f32 to vector<8x32xf32>
    %115 = arith.select %17, %113, %114 : vector<8x32xi1>, vector<8x32xf32>
    %116 = arith.addf %111, %115 : vector<8x32xf32>
    %cst_41 = arith.constant 0.000000e+00 : f32
    %117 = vector.shape_cast %107 : vector<8x1xf32> to vector<8x1xf32>
    %118 = vector.broadcast %117 : vector<8x1xf32> to vector<8x32xf32>
    %119 = vector.broadcast %cst_41 : f32 to vector<8x32xf32>
    %120 = arith.select %33, %118, %119 : vector<8x32xi1>, vector<8x32xf32>
    %121 = arith.addf %116, %120 : vector<8x32xf32>
    %cst_42 = arith.constant 0.000000e+00 : f32
    %122 = vector.shape_cast %108 : vector<8x1xf32> to vector<8x1xf32>
    %123 = vector.broadcast %122 : vector<8x1xf32> to vector<8x32xf32>
    %124 = vector.broadcast %cst_42 : f32 to vector<8x32xf32>
    %125 = arith.select %49, %123, %124 : vector<8x32xi1>, vector<8x32xf32>
    %126 = arith.addf %121, %125 : vector<8x32xf32>
    %cst_43 = arith.constant 0.000000e+00 : f32
    %127 = vector.shape_cast %109 : vector<8x1xf32> to vector<8x1xf32>
    %128 = vector.broadcast %127 : vector<8x1xf32> to vector<8x32xf32>
    %129 = vector.broadcast %cst_43 : f32 to vector<8x32xf32>
    %130 = arith.select %65, %128, %129 : vector<8x32xi1>, vector<8x32xf32>
    %131 = arith.addf %126, %130 : vector<8x32xf32>
    %cst_44 = arith.constant 0.000000e+00 : f32
    %132 = vector.shape_cast %110 : vector<8x1xf32> to vector<8x1xf32>
    %133 = vector.broadcast %132 : vector<8x1xf32> to vector<8x32xf32>
    %134 = vector.broadcast %cst_44 : f32 to vector<8x32xf32>
    %135 = arith.select %81, %133, %134 : vector<8x32xi1>, vector<8x32xf32>
    %136 = arith.addf %131, %135 : vector<8x32xf32>
    %cst_45 = arith.constant dense<0.000000e+00> : vector<8x32xf32>
    %137 = tpu.matmul %136, %2, %cst_45 {dimension_numbers = #tpu.dot_dimension_numbers<[1], [0], [0], [1], [0, 0, 1, 1], [], []>} : vector<8x32xf32>, vector<32x32xf32>, vector<8x32xf32> -> vector<8x32xf32>
    %c0_46 = arith.constant 0 : index
    %c0_47 = arith.constant 0 : index
    %138 = vector.load %arg6[%c0_46, %c0_47] : memref<8x32xf32, #tpu.memory_space<vmem>>, vector<8x32xf32>
    tpu.vector_store %arg6[%c0_46, %c0_47], %137 {strides = array<i32>} : memref<8x32xf32, #tpu.memory_space<vmem>>, vector<8x32xf32>,
    %cst_48 = arith.constant 0.000000e+00 : f32
    %139 = vector.broadcast %cst_48 : f32 to vector<8x1xf32>
    %140 = arith.cmpf ogt, %39, %23 : vector<8x1xf32>
    %141 = arith.select %140, %39, %23 : vector<8x1xi1>, vector<8x1xf32>
    %cst_49 = arith.constant 1.000000e+00 : f32
    %142 = vector.broadcast %cst_49 : f32 to vector<8x1xf32>
    %143 = arith.select %140, %142, %139 : vector<8x1xi1>, vector<8x1xf32>
    %144 = arith.cmpf ogt, %55, %141 : vector<8x1xf32>
    %145 = arith.select %144, %55, %141 : vector<8x1xi1>, vector<8x1xf32>
    %cst_50 = arith.constant 2.000000e+00 : f32
    %146 = vector.broadcast %cst_50 : f32 to vector<8x1xf32>
    %147 = arith.select %144, %146, %143 : vector<8x1xi1>, vector<8x1xf32>
    %148 = arith.cmpf ogt, %71, %145 : vector<8x1xf32>
    %149 = arith.select %148, %71, %145 : vector<8x1xi1>, vector<8x1xf32>
    %cst_51 = arith.constant 3.000000e+00 : f32
    %150 = vector.broadcast %cst_51 : f32 to vector<8x1xf32>
    %151 = arith.select %148, %150, %147 : vector<8x1xi1>, vector<8x1xf32>
    %152 = arith.cmpf ogt, %85, %149 : vector<8x1xf32>
    %cst_52 = arith.constant 4.000000e+00 : f32
    %153 = vector.broadcast %cst_52 : f32 to vector<8x1xf32>
    %154 = arith.select %152, %153, %151 : vector<8x1xi1>, vector<8x1xf32>
    %155 = tpu.iota {dimensions = array<i32: 1>} : vector<8x8xi32>
    %cst_53 = arith.constant 0.000000e+00 : f32
    %156 = vector.broadcast %cst_53 : f32 to vector<8x8xf32>
    %c0_i32 = arith.constant 0 : i32
    %157 = vector.broadcast %c0_i32 : i32 to vector<8x8xi32>
    %158 = arith.cmpi eq, %155, %157 : vector<8x8xi32>
    %159 = vector.shape_cast %106 : vector<8x1xf32> to vector<8x1xf32>
    %160 = vector.broadcast %159 : vector<8x1xf32> to vector<8x8xf32>
    %161 = arith.select %158, %160, %156 : vector<8x8xi1>, vector<8x8xf32>
    %c1_i32 = arith.constant 1 : i32
    %162 = vector.broadcast %c1_i32 : i32 to vector<8x8xi32>
    %163 = arith.cmpi eq, %155, %162 : vector<8x8xi32>
    %164 = vector.shape_cast %107 : vector<8x1xf32> to vector<8x1xf32>
    %165 = vector.broadcast %164 : vector<8x1xf32> to vector<8x8xf32>
    %166 = arith.select %163, %165, %161 : vector<8x8xi1>, vector<8x8xf32>
    %c2_i32 = arith.constant 2 : i32
    %167 = vector.broadcast %c2_i32 : i32 to vector<8x8xi32>
    %168 = arith.cmpi eq, %155, %167 : vector<8x8xi32>
    %169 = vector.shape_cast %108 : vector<8x1xf32> to vector<8x1xf32>
    %170 = vector.broadcast %169 : vector<8x1xf32> to vector<8x8xf32>
    %171 = arith.select %168, %170, %166 : vector<8x8xi1>, vector<8x8xf32>
    %c3_i32 = arith.constant 3 : i32
    %172 = vector.broadcast %c3_i32 : i32 to vector<8x8xi32>
    %173 = arith.cmpi eq, %155, %172 : vector<8x8xi32>
    %174 = vector.shape_cast %109 : vector<8x1xf32> to vector<8x1xf32>
    %175 = vector.broadcast %174 : vector<8x1xf32> to vector<8x8xf32>
    %176 = arith.select %173, %175, %171 : vector<8x8xi1>, vector<8x8xf32>
    %c4_i32 = arith.constant 4 : i32
    %177 = vector.broadcast %c4_i32 : i32 to vector<8x8xi32>
    %178 = arith.cmpi eq, %155, %177 : vector<8x8xi32>
    %179 = vector.shape_cast %110 : vector<8x1xf32> to vector<8x1xf32>
    %180 = vector.broadcast %179 : vector<8x1xf32> to vector<8x8xf32>
    %181 = arith.select %178, %180, %176 : vector<8x8xi1>, vector<8x8xf32>
    %c5_i32 = arith.constant 5 : i32
    %182 = vector.broadcast %c5_i32 : i32 to vector<8x8xi32>
    %183 = arith.cmpi eq, %155, %182 : vector<8x8xi32>
    %184 = vector.shape_cast %154 : vector<8x1xf32> to vector<8x1xf32>
    %185 = vector.broadcast %184 : vector<8x1xf32> to vector<8x8xf32>
    %186 = arith.select %183, %185, %181 : vector<8x8xi1>, vector<8x8xf32>
    %c0_54 = arith.constant 0 : index
    %c0_55 = arith.constant 0 : index
    %187 = vector.load %arg7[%c0_54, %c0_55] : memref<8x8xf32, #tpu.memory_space<vmem>>, vector<8x8xf32>
    tpu.vector_store %arg7[%c0_54, %c0_55], %186 {strides = array<i32>} : memref<8x8xf32, #tpu.memory_space<vmem>>, vector<8x8xf32>,
    return
  }
  func.func @transform_0(%arg0: i32) -> (i32, i32) {
    %c0_i32 = arith.constant 0 : i32
    %c0_i32_0 = arith.constant 0 : i32
    %c0_i32_1 = arith.constant 0 : i32
    return %c0_i32, %c0_i32_0 : i32, i32
  }
  func.func @transform_1(%arg0: i32) -> (i32, i32) {
    %c0_i32 = arith.constant 0 : i32
    %c0_i32_0 = arith.constant 0 : i32
    %c0_i32_1 = arith.constant 0 : i32
    return %c0_i32, %c0_i32_0 : i32, i32
  }
  func.func @transform_2(%arg0: i32) -> (i32, i32) {
    %c0_i32 = arith.constant 0 : i32
    %c0_i32_0 = arith.constant 0 : i32
    %c0_i32_1 = arith.constant 0 : i32
    return %c0_i32, %c0_i32_0 : i32, i32
  }
  func.func @transform_3(%arg0: i32) -> (i32, i32) {
    %c0_i32 = arith.constant 0 : i32
    %c0_i32_0 = arith.constant 0 : i32
    %c0_i32_1 = arith.constant 0 : i32
    return %c0_i32, %c0_i32_0 : i32, i32
  }
  func.func @transform_4(%arg0: i32) -> (i32, i32) {
    %c0_i32 = arith.constant 0 : i32
    %c0_i32_0 = arith.constant 0 : i32
    %c0_i32_1 = arith.constant 0 : i32
    return %c0_i32, %c0_i32_0 : i32, i32
  }
  func.func @transform_5(%arg0: i32) -> (i32, i32) {
    %c0_i32 = arith.constant 0 : i32
    %c0_i32_0 = arith.constant 0 : i32
    %c0_i32_1 = arith.constant 0 : i32
    return %c0_i32, %c0_i32_0 : i32, i32
  }
  func.func @transform_6(%arg0: i32) -> (i32, i32) {
    %c0_i32 = arith.constant 0 : i32
    %c0_i32_0 = arith.constant 0 : i32
    %c0_i32_1 = arith.constant 0 : i32
    return %c0_i32, %c0_i32_0 : i32, i32
  }
}

</mosaic_0001>

<bundles_post_ra>
// kernel: mask_generator_soft.1
= control target key start
LH: loop header
LB: loop body
LE: loop exit
PB: predicated region body
PF: predicated region fallthrough
CT: control target
= control target key end

     0   :  { %12 = vsyncpa [#allocation3], 0  ;;  %s1058_s0 = inlined_call_operand.hbm [shape: f32[8,32], index: 0, kind: input, shape index: {}]   ;;  %s1059_s1 = inlined_call_operand.hbm [shape: f32[32,32], index: 1, kind: input, shape index: {}]   ;;  %s1060_s2 = inlined_call_operand.hbm [shape: f32[8,32], index: 2, kind: input, shape index: {}]   ;;  %s1061_s3 = inlined_call_operand.hbm [shape: f32[32,32], index: 3, kind: input, shape index: {}]   ;;  %s1062_s4 = inlined_call_operand.hbm [shape: f32[8,32], index: 4, kind: output, shape index: {0}]   ;;  %s1063_s5 = inlined_call_operand.hbm [shape: f32[8,32], index: 5, kind: output, shape index: {1}]   ;;  %s1064_s6 = inlined_call_operand.vmem [shape: f32[8,8], index: 6, kind: output, shape index: {2}]  }
   0x1   :  { %13 = vsyncpa [#allocation6], 0 }
   0x2   :  { %14 = vsyncpa [#allocation9], 0 }
   0x3   :  { %15 = vsyncpa [#allocation4], 0 }
   0x4   :  { %16 = vsyncpa [#allocation12], 0  ;;  %s806_s21 = smov [#allocation5]   ;;  %s664_s25 = scalar_lea.hbm %s1059_s1, 512 }
   0x5   :  { %s32_s22 = sshll.u32 %s806_s21, 4  ;;  %p665_p0 = scmp.ne.s32.totalorder %s1059_s1, %s664_s25  ;;  %s33_s22 = int_to_ptr.vmem [resolvable:$true] %s32_s22 }
   0x6   :  { %p668_p1 = scmp.lt.u32.totalorder %s664_s25, %s1059_s1 }
   0x8   :  { %p670_p2 = pnand %p668_p1, %p665_p0 }
   0xa   :  { %673 = shalt.err (!%p670_p2)
}
   0xb   :  { %s674_s30 = scalar_lea.vmem %s33_s22, 512  ;;  %p679_p4 = scmp.lt.s32.totalorder %s33_s22, %s33_s22 }
   0xc   :  { %p675_p3 = scmp.ne.s32.totalorder %s33_s22, %s674_s30  ;;  %p680_p5 = scmp.lt.s32.totalorder %s674_s30, %s674_s30 }
   0xe   :  { %p681_p6 = por %p680_p5, %p679_p4 }
  0x10   :  { %p682_p7 = pnand %p681_p6, %p675_p3 }
  0x12   :  { %685 = shalt.err (!%p682_p7)
}
  0x13   :  { %s807_s7 = smov 128   ;;  %s808_s8 = smov 8  }
  0x14   :  { %38 = dma.hbm_to_vmem [thread:$0]  %s1059_s1, 512, %s33_s22, [#allocation6], %s807_s7, %s807_s7, %s808_s8  }
  0x15   :  { %s809_s11 = smov [#allocation2]   ;;  %s810_s13 = smov [#allocation7]  }
  0x16   :  { %s23_s12 = sshll.u32 %s809_s11, 4  ;;  %s45_s14 = sshll.u32 %s810_s13, 4  ;;  %s24_s12 = int_to_ptr.vmem [resolvable:$true] %s23_s12  ;;  %s46_s14 = int_to_ptr.vmem [resolvable:$true] %s45_s14 }
  0x17   :  { %s686_s17 = scalar_lea.hbm %s1058_s0, 128 }
  0x18   :  { %p687_p8 = scmp.ne.s32.totalorder %s1058_s0, %s686_s17  ;;  %p690_p9 = scmp.lt.u32.totalorder %s686_s17, %s1058_s0 }
  0x1a   :  { %p692_p10 = pnand %p690_p9, %p687_p8 }
  0x1c   :  { %695 = shalt.err (!%p692_p10)
}
  0x1d   :  { %s696_s1 = scalar_lea.vmem %s24_s12, 128  ;;  %p701_p12 = scmp.lt.s32.totalorder %s24_s12, %s24_s12 }
  0x1e   :  { %p697_p11 = scmp.ne.s32.totalorder %s24_s12, %s696_s1  ;;  %p702_p13 = scmp.lt.s32.totalorder %s696_s1, %s696_s1 }
  0x20   :  { %p703_p0 = por %p702_p13, %p701_p12 }
  0x22   :  { %p704_p1 = pnand %p703_p0, %p697_p11 }
  0x24   :  { %707 = shalt.err (!%p704_p1)
}
  0x25   :  { %26 = dma.hbm_to_vmem [thread:$0]  %s1058_s0, 128, %s24_s12, [#allocation3]  }
  0x26   :  { %s708_s26 = scalar_lea.hbm %s1060_s2, 128 }
  0x27   :  { %p709_p2 = scmp.ne.s32.totalorder %s1060_s2, %s708_s26  ;;  %p712_p3 = scmp.lt.u32.totalorder %s708_s26, %s1060_s2 }
  0x29   :  { %p714_p4 = pnand %p712_p3, %p709_p2 }
  0x2b   :  { %717 = shalt.err (!%p714_p4)
}
  0x2c   :  { %s718_s9 = scalar_lea.vmem %s46_s14, 128  ;;  %p723_p6 = scmp.lt.s32.totalorder %s46_s14, %s46_s14 }
  0x2d   :  { %p719_p5 = scmp.ne.s32.totalorder %s46_s14, %s718_s9  ;;  %p724_p7 = scmp.lt.s32.totalorder %s718_s9, %s718_s9 }
  0x2f   :  { %p725_p8 = por %p724_p7, %p723_p6 }
  0x31   :  { %p726_p9 = pnand %p725_p8, %p719_p5 }
  0x33   :  { %729 = shalt.err (!%p726_p9)
}
  0x34   :  { %48 = dma.hbm_to_vmem [thread:$0]  %s1060_s2, 128, %s46_s14, [#allocation6]  }
  0x35   :  { %s811_s11 = smov [#allocation8]   ;;  %s730_s16 = scalar_lea.hbm %s1061_s3, 512 }
  0x36   :  { %s54_s12 = sshll.u32 %s811_s11, 4  ;;  %p731_p10 = scmp.ne.s32.totalorder %s1061_s3, %s730_s16  ;;  %s55_s12 = int_to_ptr.vmem [resolvable:$true] %s54_s12 }
  0x37   :  { %p734_p11 = scmp.lt.u32.totalorder %s730_s16, %s1061_s3 }
  0x39   :  { %p736_p12 = pnand %p734_p11, %p731_p10 }
  0x3b   :  { %739 = shalt.err (!%p736_p12)
}
  0x3c   :  { %s740_s21 = scalar_lea.vmem %s55_s12, 512  ;;  %p745_p0 = scmp.lt.s32.totalorder %s55_s12, %s55_s12 }
  0x3d   :  { %p741_p13 = scmp.ne.s32.totalorder %s55_s12, %s740_s21  ;;  %p746_p1 = scmp.lt.s32.totalorder %s740_s21, %s740_s21 }
  0x3f   :  { %p747_p2 = por %p746_p1, %p745_p0 }
  0x41   :  { %p748_p3 = pnand %p747_p2, %p741_p13 }
  0x43   :  { %751 = shalt.err (!%p748_p3)
}
  0x44   :  { %60 = dma.hbm_to_vmem [thread:$0]  %s1061_s3, 512, %s55_s12, [#allocation9], %s807_s7, %s807_s7, %s808_s8  }
  0x45   :  { %796 = dma.done.wait [#allocation3], 128  }
  0x46   :  { %797 = vsyncadd [#allocation3], 4294967168 }
  0x47   :  { %798 = dma.done.wait [#allocation6], 640  }
  0x48   :  { %799 = vsyncadd [#allocation6], 4294966656 }
  0x49   :  { %800 = dma.done.wait [#allocation9], 512  }
  0x4a   :  { %801 = vsyncadd [#allocation9], 4294966784  ;;  %v812_v0 = vmov 0.0|0.0   ;;  %vm813_vm0 = vmmov 0   ;;  %v814_v1 = vmov 0.0   ;;  %vm82_vm1 = vcmask 261120  }
  0x4b   :  { %619 = vmatprep.subr.bf16.mxu0 %v812_v0  ;;  %594 = vmatprep.mubr.msk.f32.mxu0 %vm813_vm0, %v814_v1  ;;  %vm912_vm2 = vmpackc.low %vm82_vm1, %vm82_vm1  ;;  %v254_v3 = vld [vmem:[#allocation2] sm:$0xff]  ;;  %v74_v4 = vld [vmem:[#allocation8] sm:$0xff]  ;;  %v255_v18 = vlaneseq  ;;  %s815_s8 = smov [#allocation10]  }
  0x4c   :  { %627 = vmatprep.subr.bf16.mxu1 %v812_v0  ;;  %605 = vmatprep.mubr.msk.f32.mxu1 %vm813_vm0, %v814_v1  ;;  %v75_v5 = vld [vmem:[#allocation8 + $0x8] sm:$0xff]  ;;  %v257_v6 = vsel %vm82_vm1, %v254_v3, -inf  ;;  %v76_v8 = vld [vmem:[#allocation8 + $0x10] sm:$0xff]  ;;  %v77_v9 = vld [vmem:[#allocation8 + $0x18] sm:$0xff]  ;;  %s531_s1 = sshll.u32 %s815_s8, 4  ;;  %s532_s1 = int_to_ptr.vmem [resolvable:$true] %s531_s1 }
  0x4d   :  { %v620_v7 = vpack.c.bf16 %v75_v5, %v74_v4  ;;  %258 = vmax.xlane.f32.xlu0 %v257_v6  ;;  %v624_v10 = vpack.c.bf16 %v77_v9, %v76_v8  ;;  %v73_v11 = vld [vmem:[#allocation7] sm:$0xff]  ;;  %v79_v13 = vld [vmem:[#allocation5 + $0x8] sm:$0xff]  ;;  %v80_v15 = vld [vmem:[#allocation5 + $0x10] sm:$0xff]  ;;  %v928_v19 = vand.u32 127, %v255_v18  ;;  %s752_s22 = scalar_lea.vmem %s532_s1, 128  ;;  %p757_p5 = scmp.lt.s32.totalorder %s532_s1, %s532_s1 }
  0x4e   :  { %v78_v12 = vld [vmem:[#allocation5] sm:$0xff]  ;;  %v81_v16 = vld [vmem:[#allocation5 + $0x18] sm:$0xff]  ;;  %p753_p4 = scmp.ne.s32.totalorder %s532_s1, %s752_s22  ;;  %p758_p6 = scmp.lt.s32.totalorder %s752_s22, %s752_s22 }
  0x4f   :  { %622 = vmatpush3.bf16.xpose.msk.msra.mxu0 %vm912_vm2, %v620_v7  ;;  %v628_v14 = vpack.c.bf16 %v79_v13, %v78_v12  ;;  %v632_v17 = vpack.c.bf16 %v81_v16, %v80_v15 }
  0x50   :  { %623 = vmatprep.subr.bf16.mxu0 %v812_v0  ;;  %p759_p7 = por %p758_p6, %p757_p5 }
  0x51   :  { %630 = vmatpush3.bf16.xpose.msk.msra.mxu1 %vm912_vm2, %v628_v14 }
  0x52   :  { %631 = vmatprep.subr.bf16.mxu1 %v812_v0  ;;  %p760_p8 = pnand %p759_p7, %p753_p4 }
  0x57   :  { %626 = vmatpush3.bf16.xpose.msk.msra.mxu0 %vm912_vm2, %v624_v10 }
  0x58   :  { %635 = vmatprep.subr.bf16.mxu0 %v812_v0 }
  0x59   :  { %634 = vmatpush3.bf16.xpose.msk.msra.mxu1 %vm912_vm2, %v632_v17 }
  0x5e   :  { %595 = vmatmul.mubr.msk.f32.vlgmr.msra.gmra.mrb[0].mxu0 %vm82_vm1, %v73_v11 }
  0x5f   :  { %616 = vmatprep.mubr.msk.f32.mxu0 %vm813_vm0, %v814_v1  ;;  %637 = vmatpush3.bf16.msra.mxu0 %v628_v14 }
  0x60   :  { %638 = vmatprep.subr.bf16.mxu0 %v812_v0 }
  0x63   :  { %640 = vmatpush3.bf16.msra.mxu0 %v632_v17 }
  0xda   :  { %v259_v20 = vpop.xlane.xlu0 %258 }
  0xdb   :  { %vm260_vm3 = vcmp.eq.f32.partialorder %v254_v3, %v259_v20 }
  0xdc   :  { %v261_v21 = vsel %vm260_vm3, %v928_v19, 32 }
  0xdd   :  { %v262_v22 = vsel %vm82_vm1, %v261_v21, 2147483647 }
  0xde   :  { %v264_v23 = vshra.s32 %v262_v22, 16  ;;  %v263_v27 = vand.u32 65535, %v262_v22 }
  0xe0   :  { %v266_v24 = vcvt.s32.f32 %v264_v23  ;;  %v265_v29 = vcvt.s32.f32 %v263_v27 }
  0xe2   :  { %267 = vmin.xlane.f32.xlu0 %v266_v24 }
 0x131   :  { %v164_v25 = vpop.f32.mrb[0].mxu0 }
 0x132   :  { %168 = vst.msk [vmem:[#allocation10] sm:$0xff] %vm82_vm1, %v164_v25  ;;  %606 = vmatmul.mubr.msk.f32.vlgmr.msra.gmra.mrb[0].mxu1 %vm82_vm1, %v164_v25  ;;  %v596_v26 = vpop.f32.mrb[1].mxu0 }
 0x16f   :  { %v268_v28 = vpop.xlane.xlu0 %267 }
 0x170   :  { %vm269_vm4 = vcmp.eq.f32.partialorder %v266_v24, %v268_v28  ;;  %v274_v31 = vcvt.f32.s32 %v268_v28 }
 0x171   :  { %v270_v30 = vsel %vm269_vm4, %v265_v29, inf }
 0x172   :  { %271 = vmin.xlane.f32.xlu1 %v270_v30  ;;  %v275_v33 = vshll.u32 %v274_v31, 16 }
 0x1ff   :  { %v272_v32 = vpop.xlane.xlu1 %271 }
 0x200   :  { %v273_v34 = vcvt.f32.s32 %v272_v32 }
 0x202   :  { %v934_v35 = vadd.s32 %v275_v33, %v273_v34 }
 0x204   :  { %vm277_vm5 = vcmp.eq.s32.totalorder %v928_v19, %v934_v35 }
 0x205   :  { %v938_v36 = vpop.f32.mrb[0].mxu1  ;;  %v278_v37 = vsel %vm277_vm5, -inf, %v254_v3 }
 0x206   :  { %v607_v38 = vpop.f32.mrb[1].mxu1  ;;  %v283_v39 = vsel %vm82_vm1, %v278_v37, -inf  ;;  %v279_v31 = vsel %vm277_vm5, %v938_v36, 0.0 }
 0x207   :  { %284 = vmax.xlane.f32.xlu1 %v283_v39  ;;  %v280_v32 = vsel %vm82_vm1, %v279_v31, 0.0 }
 0x294   :  { %v285_v40 = vpop.xlane.xlu1 %284 }
 0x295   :  { %vm286_vm6 = vcmp.eq.f32.partialorder %v278_v37, %v285_v40 }
 0x296   :  { %v287_v41 = vsel %vm286_vm6, %v928_v19, 32 }
 0x297   :  { %v288_v42 = vsel %vm82_vm1, %v287_v41, 2147483647 }
 0x298   :  { %v290_v43 = vshra.s32 %v288_v42, 16  ;;  %v289_v45 = vand.u32 65535, %v288_v42 }
 0x29a   :  { %v292_v44 = vcvt.s32.f32 %v290_v43  ;;  %v291_v47 = vcvt.s32.f32 %v289_v45 }
 0x29c   :  { %293 = vmin.xlane.f32.xlu0 %v292_v44 }
 0x329   :  { %v294_v46 = vpop.xlane.xlu0 %293 }
 0x32a   :  { %vm295_vm7 = vcmp.eq.f32.partialorder %v292_v44, %v294_v46  ;;  %v300_v49 = vcvt.f32.s32 %v294_v46 }
 0x32b   :  { %v296_v48 = vsel %vm295_vm7, %v291_v47, inf  ;;  %vm511_vm7 = vcmp.eq.s32.totalorder %v928_v19, 0 }
 0x32c   :  { %297 = vmin.xlane.f32.xlu1 %v296_v48  ;;  %v301_v51 = vshll.u32 %v300_v49, 16 }
 0x3b9   :  { %v298_v50 = vpop.xlane.xlu1 %297 }
 0x3ba   :  { %v299_v52 = vcvt.f32.s32 %v298_v50 }
 0x3bc   :  { %v946_v53 = vadd.s32 %v301_v51, %v299_v52 }
 0x3be   :  { %vm303_vm8 = vcmp.eq.s32.totalorder %v928_v19, %v946_v53 }
 0x3bf   :  { %v304_v54 = vsel %vm303_vm8, -inf, %v278_v37  ;;  %v305_v41 = vsel %vm303_vm8, %v938_v36, 0.0 }
 0x3c0   :  { %v309_v55 = vsel %vm82_vm1, %v304_v54, -inf  ;;  %v306_v42 = vsel %vm82_vm1, %v305_v41, 0.0 }
 0x3c1   :  { %310 = vmax.xlane.f32.xlu0 %v309_v55 }
 0x44e   :  { %v311_v56 = vpop.xlane.xlu0 %310 }
 0x44f   :  { %vm312_vm9 = vcmp.eq.f32.partialorder %v304_v54, %v311_v56 }
 0x450   :  { %v313_v57 = vsel %vm312_vm9, %v928_v19, 32  ;;  %vm513_vm9 = vcmp.eq.s32.totalorder %v928_v19, 1 }
 0x451   :  { %v314_v58 = vsel %vm82_vm1, %v313_v57, 2147483647 }
 0x452   :  { %v316_v59 = vshra.s32 %v314_v58, 16  ;;  %v315_v61 = vand.u32 65535, %v314_v58 }
 0x454   :  { %v318_v60 = vcvt.s32.f32 %v316_v59  ;;  %v317_v63 = vcvt.s32.f32 %v315_v61 }
 0x456   :  { %319 = vmin.xlane.f32.xlu1 %v318_v60 }
 0x4e3   :  { %v320_v62 = vpop.xlane.xlu1 %319 }
 0x4e4   :  { %vm321_vm10 = vcmp.eq.f32.partialorder %v318_v60, %v320_v62  ;;  %v326_v2 = vcvt.f32.s32 %v320_v62 }
 0x4e5   :  { %v322_v0 = vsel %vm321_vm10, %v317_v63, inf  ;;  %vm515_vm10 = vcmp.eq.s32.totalorder %v928_v19, 2 }
 0x4e6   :  { %323 = vmin.xlane.f32.xlu0 %v322_v0  ;;  %v327_v4 = vshll.u32 %v326_v2, 16 }
 0x573   :  { %v324_v3 = vpop.xlane.xlu0 %323 }
 0x574   :  { %v325_v5 = vcvt.f32.s32 %v324_v3 }
 0x576   :  { %v956_v6 = vadd.s32 %v327_v4, %v325_v5 }
 0x578   :  { %vm329_vm11 = vcmp.eq.s32.totalorder %v928_v19, %v956_v6 }
 0x579   :  { %v330_v7 = vsel %vm329_vm11, -inf, %v304_v54  ;;  %v331_v33 = vsel %vm329_vm11, %v938_v36, 0.0 }
 0x57a   :  { %v335_v8 = vsel %vm82_vm1, %v330_v7, -inf  ;;  %v332_v34 = vsel %vm82_vm1, %v331_v33, 0.0 }
 0x57b   :  { %336 = vmax.xlane.f32.xlu1 %v335_v8 }
 0x608   :  { %v337_v9 = vpop.xlane.xlu1 %336 }
 0x609   :  { %vm338_vm12 = vcmp.eq.f32.partialorder %v330_v7, %v337_v9 }
 0x60a   :  { %v339_v10 = vsel %vm338_vm12, %v928_v19, 32  ;;  %vm517_vm12 = vcmp.eq.s32.totalorder %v928_v19, 3 }
 0x60b   :  { %v340_v11 = vsel %vm82_vm1, %v339_v10, 2147483647 }
 0x60c   :  { %v342_v12 = vshra.s32 %v340_v11, 16  ;;  %v341_v14 = vand.u32 65535, %v340_v11 }
 0x60e   :  { %v344_v13 = vcvt.s32.f32 %v342_v12  ;;  %v343_v16 = vcvt.s32.f32 %v341_v14 }
 0x610   :  { %345 = vmin.xlane.f32.xlu0 %v344_v13 }
 0x69d   :  { %v346_v15 = vpop.xlane.xlu0 %345 }
 0x69e   :  { %vm347_vm13 = vcmp.eq.f32.partialorder %v344_v13, %v346_v15  ;;  %v352_v18 = vcvt.f32.s32 %v346_v15 }
 0x69f   :  { %v348_v17 = vsel %vm347_vm13, %v343_v16, inf  ;;  %vm519_vm13 = vcmp.eq.s32.totalorder %v928_v19, 4 }
 0x6a0   :  { %349 = vmin.xlane.f32.xlu1 %v348_v17  ;;  %v353_v21 = vshll.u32 %v352_v18, 16 }
 0x72d   :  { %v350_v20 = vpop.xlane.xlu1 %349 }
 0x72e   :  { %v351_v22 = vcvt.f32.s32 %v350_v20 }
 0x730   :  { %v966_v23 = vadd.s32 %v353_v21, %v351_v22 }
 0x732   :  { %vm355_vm14 = vcmp.eq.s32.totalorder %v928_v19, %v966_v23 }
 0x733   :  { %v356_v24 = vsel %vm355_vm14, -inf, %v330_v7  ;;  %v357_v43 = vsel %vm355_vm14, %v938_v36, 0.0 }
 0x734   :  { %v361_v25 = vsel %vm82_vm1, %v356_v24, -inf  ;;  %v358_v44 = vsel %vm82_vm1, %v357_v43, 0.0 }
 0x735   :  { %362 = vmax.xlane.f32.xlu0 %v361_v25 }
 0x7c2   :  { %v363_v26 = vpop.xlane.xlu0 %362 }
 0x7c3   :  { %vm364_vm15 = vcmp.eq.f32.partialorder %v356_v24, %v363_v26 }
 0x7c4   :  { %v365_v27 = vsel %vm364_vm15, %v928_v19, 32 }
 0x7c5   :  { %v366_v28 = vsel %vm82_vm1, %v365_v27, 2147483647 }
 0x7c6   :  { %v368_v29 = vshra.s32 %v366_v28, 16  ;;  %v367_v37 = vand.u32 65535, %v366_v28 }
 0x7c8   :  { %v370_v30 = vcvt.s32.f32 %v368_v29  ;;  %v369_v39 = vcvt.s32.f32 %v367_v37 }
 0x7ca   :  { %371 = vmin.xlane.f32.xlu1 %v370_v30 }
 0x7ce   :  { %281 = vadd.xlane.f32.xlu1 %v280_v32 }
 0x7d2   :  { %333 = vadd.xlane.f32.xlu1 %v332_v34 }
 0x857   :  { %v372_v38 = vpop.xlane.xlu1 %371 }
 0x858   :  { %vm373_vm0 = vcmp.eq.f32.partialorder %v370_v30, %v372_v38  ;;  %v378_v45 = vcvt.f32.s32 %v372_v38 }
 0x859   :  { %v374_v40 = vsel %vm373_vm0, %v369_v39, inf  ;;  %vm521_vm0 = vcmp.eq.s32.totalorder %v928_v19, 5 }
 0x85a   :  { %375 = vmin.xlane.f32.xlu0 %v374_v40  ;;  %v379_v47 = vshll.u32 %v378_v45, 16 }
 0x85b   :  { %v282_v52 = vpop.xlane.xlu1 %281 }
 0x85e   :  { %307 = vadd.xlane.f32.xlu0 %v306_v42 }
 0x85f   :  { %v334_v56 = vpop.xlane.xlu1 %333 }
 0x862   :  { %359 = vadd.xlane.f32.xlu0 %v358_v44 }
 0x8e7   :  { %v376_v46 = vpop.xlane.xlu0 %375 }
 0x8e8   :  { %v377_v48 = vcvt.f32.s32 %v376_v46 }
 0x8ea   :  { %v996_v49 = vadd.s32 %v379_v47, %v377_v48 }
 0x8eb   :  { %v308_v54 = vpop.xlane.xlu0 %307 }
 0x8ec   :  { %vm381_vm2 = vcmp.eq.s32.totalorder %v928_v19, %v996_v49  ;;  %v386_v55 = vmax.f32 %v282_v52, %v308_v54  ;;  %vm500_vm3 = vcmp.gt.f32.partialorder %v308_v54, %v282_v52 }
 0x8ed   :  { %v382_v50 = vsel %vm381_vm2, %v938_v36, 0.0  ;;  %v501_v18 = vsel %vm500_vm3, %v308_v54, %v282_v52  ;;  %v502_v21 = vsel %vm500_vm3, 1.0, %v814_v1 }
 0x8ee   :  { %v383_v51 = vsel %vm82_vm1, %v382_v50, 0.0  ;;  %v387_v57 = vmax.f32 %v386_v55, %v334_v56  ;;  %vm503_vm4 = vcmp.gt.f32.partialorder %v334_v56, %v501_v18 }
 0x8ef   :  { %384 = vadd.xlane.f32.xlu1 %v383_v51  ;;  %v360_v58 = vpop.xlane.xlu0 %359  ;;  %v504_v20 = vsel %vm503_vm4, %v334_v56, %v501_v18  ;;  %v505_v27 = vsel %vm503_vm4, 2.0, %v502_v21 }
 0x8f0   :  { %v388_v59 = vmax.f32 %v387_v57, %v360_v58  ;;  %vm506_vm6 = vcmp.gt.f32.partialorder %v360_v58, %v504_v20 }
 0x8f1   :  { %v507_v28 = vsel %vm506_vm6, %v360_v58, %v504_v20  ;;  %v508_v35 = vsel %vm506_vm6, 3.0, %v505_v27 }
 0x97c   :  { %v385_v60 = vpop.xlane.xlu1 %384 }
 0x97d   :  { %v389_v61 = vmax.f32 %v388_v59, %v385_v60  ;;  %vm509_vm15 = vcmp.gt.f32.partialorder %v385_v60, %v507_v28 }
 0x97e   :  { %v510_v53 = vsel %vm509_vm15, 4.0, %v508_v35 }
 0x97f   :  { %v390_v62 = vsub.f32 %v282_v52, %v389_v61  ;;  %v393_v63 = vsub.f32 %v308_v54, %v389_v61  ;;  %v396_v0 = vsub.f32 %v334_v56, %v389_v61  ;;  %v399_v2 = vsub.f32 %v360_v58, %v389_v61 }
 0x980   :  { %v402_v36 = vsub.f32 %v385_v60, %v389_v61 }
 0x981   :  { %v391_v3 = vmul.f32 1.442695, %v390_v62  ;;  %v394_v4 = vmul.f32 1.442695, %v393_v63  ;;  %v397_v5 = vmul.f32 1.442695, %v396_v0 }
 0x982   :  { %v400_v7 = vmul.f32 1.442695, %v399_v2  ;;  %v403_v8 = vmul.f32 1.442695, %v402_v36 }
 0x983   :  { %652 = vpow2.f32 %v391_v3 }
 0x984   :  { %654 = vpow2.f32 %v394_v4 }
 0x985   :  { %656 = vpow2.f32 %v397_v5 }
 0x986   :  { %658 = vpow2.f32 %v400_v7 }
 0x987   :  { %660 = vpow2.f32 %v403_v8 }
 0x98d   :  { %v653_v9 = vpop.eup %652 }
 0x98e   :  { %v655_v10 = vpop.eup %654 }
 0x98f   :  { %v405_v11 = vadd.f32 %v655_v10, %v653_v9  ;;  %v657_v12 = vpop.eup %656 }
 0x990   :  { %v659_v14 = vpop.eup %658 }
 0x991   :  { %v406_v13 = vadd.f32 %v657_v12, %v405_v11  ;;  %v661_v16 = vpop.eup %660 }
 0x993   :  { %v407_v15 = vadd.f32 %v659_v14, %v406_v13 }
 0x995   :  { %v408_v17 = vadd.f32 %v661_v16, %v407_v15 }
 0x997   :  { %662 = vrcp.f32 %v408_v17 }
 0x9a1   :  { %v663_v22 = vpop.eup %662 }
 0x9a2   :  { %v411_v24 = vmul.f32 %v663_v22, %v653_v9  ;;  %v412_v25 = vmul.f32 %v663_v22, %v655_v10  ;;  %v413_v26 = vmul.f32 %v663_v22, %v657_v12  ;;  %v414_v29 = vmul.f32 %v663_v22, %v659_v14 }
 0x9a3   :  { %v415_v34 = vmul.f32 %v663_v22, %v661_v16 }
 0x9a4   :  { %v512_v30 = vsel %vm511_vm7, %v411_v24, 0.0  ;;  %v416_v1 = vsel %vm277_vm5, %v411_v24, 0.0  ;;  %v418_v31 = vsel %vm303_vm8, %v412_v25, 0.0  ;;  %v420_v38 = vsel %vm329_vm11, %v413_v26, 0.0 }
 0x9a5   :  { %v514_v32 = vsel %vm513_vm9, %v412_v25, %v512_v30  ;;  %v419_v33 = vadd.f32 %v418_v31, %v416_v1  ;;  %vm523_vm5 = vcmask 64512   ;;  %v422_v42 = vsel %vm355_vm14, %v414_v29, 0.0 }
 0x9a6   :  { %v516_v37 = vsel %vm515_vm10, %v413_v26, %v514_v32  ;;  %v424_v6 = vsel %vm381_vm2, %v415_v34, 0.0 }
 0x9a7   :  { %v518_v39 = vsel %vm517_vm12, %v414_v29, %v516_v37  ;;  %v421_v40 = vadd.f32 %v420_v38, %v419_v33 }
 0x9a8   :  { %v520_v41 = vsel %vm519_vm13, %v415_v34, %v518_v39 }
 0x9a9   :  { %v522_v43 = vsel %vm521_vm0, %v510_v53, %v520_v41  ;;  %v423_v44 = vadd.f32 %v422_v42, %v421_v40 }
 0x9aa   :  { %524 = vst.msk [vmem:[%s1064_s6] sm:$0xff] %vm523_vm5, %v522_v43 }
 0x9ab   :  { %v425_v45 = vadd.f32 %v424_v6, %v423_v44 }
 0x9ad   :  { %617 = vmatmul.mubr.msk.f32.vlgmr.msra.gmra.mrb[2].mxu0 %vm82_vm1, %v425_v45 }
 0x9ae   :  { %763 = shalt.err (!%p760_p8)
}
 0x9af   :  { %s764_s6 = scalar_lea.hbm %s1062_s4, 128 }
 0x9b0   :  { %p765_p9 = scmp.ne.s32.totalorder %s1062_s4, %s764_s6  ;;  %p768_p10 = scmp.lt.u32.totalorder %s764_s6, %s1062_s4 }
 0x9b2   :  { %p770_p11 = pnand %p768_p10, %p765_p9 }
 0x9b4   :  { %773 = shalt.err (!%p770_p11)
}
 0x9b5   :  { %534 = dma.vmem_to_hbm [thread:$0]  %s532_s1, 128, %s1062_s4, [#allocation4]  }
 0x9b6   :  { %s816_s9 = smov [#allocation11]  }
 0x9b7   :  { %s541_s0 = sshll.u32 %s816_s9, 4  ;;  %s542_s0 = int_to_ptr.vmem [resolvable:$true] %s541_s0 }
 0x9b8   :  { %s774_s10 = scalar_lea.vmem %s542_s0, 128  ;;  %p779_p13 = scmp.lt.s32.totalorder %s542_s0, %s542_s0 }
 0x9b9   :  { %p775_p12 = scmp.ne.s32.totalorder %s542_s0, %s774_s10  ;;  %p780_p0 = scmp.lt.s32.totalorder %s774_s10, %s774_s10 }
 0x9bb   :  { %p781_p1 = por %p780_p0, %p779_p13 }
 0x9bd   :  { %p782_p2 = pnand %p781_p1, %p775_p12 }
 0xa80   :  { %v495_v19 = vpop.f32.mrb[2].mxu0 }
 0xa81   :  { %499 = vst.msk [vmem:[#allocation11] sm:$0xff] %vm82_vm1, %v495_v19  ;;  %v618_v23 = vpop.f32.mrb[3].mxu0 }
 0xa82   :  { %785 = shalt.err (!%p782_p2)
}
 0xa83   :  { %s786_s13 = scalar_lea.hbm %s1063_s5, 128 }
 0xa84   :  { %p787_p3 = scmp.ne.s32.totalorder %s1063_s5, %s786_s13  ;;  %p790_p4 = scmp.lt.u32.totalorder %s786_s13, %s1063_s5 }
 0xa86   :  { %p792_p5 = pnand %p790_p4, %p787_p3 }
 0xa88   :  { %795 = shalt.err (!%p792_p5)
}
 0xa89   :  { %544 = dma.vmem_to_hbm [thread:$0]  %s542_s0, 128, %s1063_s5, [#allocation12]  }
 0xa8a   :  { %802 = dma.done.wait [#allocation4], 128  }
 0xa8b   :  { %803 = vsyncadd [#allocation4], 4294967168 }
 0xa8c   :  { %804 = dma.done.wait [#allocation12], 128  }
 0xa8d   :  { %805 = vsyncadd [#allocation12], 4294967168 }
 0xa8e   :  { %555 = vsyncpa [#allocation3], 1 }
 0xa8f   :  { %556 = vsyncpa [#allocation6], 1 }
 0xa90   :  { %557 = vsyncpa [#allocation9], 1 }
 0xa91   :  { %558 = vsyncpa [#allocation4], 1 }
 0xa92   :  { %559 = vsyncpa [#allocation12], 1 }

</bundles_post_ra>
